<compile_context>
chip_gen: v5e
topology: v5e:2x2
jax: 0.10.0
libtpu: 0.0.40
codegen_flags: <defaults>
</compile_context>

<pallas_src>
import functools

import jax
import jax.numpy as jnp
from jax import lax
from jax.experimental import pallas as pl
from jax.experimental.pallas import tpu as pltpu


# ------------------------- model hyper-parameters -------------------------
PERCEPTUAL_FEATURES = 32
LATENT_GOAL_FEATURES = 16
PLAN_FEATURES = 32
HIDDEN_SIZE = 32
OUT_FEATURES = 7
N_DIST = 10
LOG_SCALE_MIN = -7.0

IN_FEATURES = PERCEPTUAL_FEATURES + LATENT_GOAL_FEATURES + PLAN_FEATURES   # 80
D_OUT = OUT_FEATURES * N_DIST                                              # 70
N_HEADS = 3                      # [logit_probs, log_scales, means]
HEADS_W = 256                    # 3*70 = 210 packed back-to-back, padded to 256


# ------------------------------ Pallas kernel ------------------------------
def _decoder_kernel(
    seq_len, batch,
    # inputs
    x_ref,        # (S*B, IN)       time-major, row = t*B + b
    h0_ref,       # (2, B, H)       initial hidden state (both layers)
    wih0_ref,     # (IN, H)
    whh0_ref,     # (H, H)
    b0_ref,       # (1, H)          bias_ih_l0 + bias_hh_l0
    wcat1_ref,    # (2H, H)         [wih1 ; whh1] fused layer-1 weight
    b1_ref,       # (1, H)          bias_ih_l1 + bias_hh_l1
    wh_ref,       # (H, HEADS_W)    fused, lane-padded [prob | log_scale | mean]
    bh_ref,       # (1, HEADS_W)
    # outputs
    heads_ref,    # (S*B, HEADS_W)
    hn_ref,       # (2, B, H)
):
    H = HIDDEN_SIZE

    # ---- hoisted input projection: ONE big matmul, bias folded, kept in vregs
    xp = (
        jnp.dot(x_ref[...], wih0_ref[...], preferred_element_type=jnp.float32)
        + b0_ref[...]
    )  # (S*B, H)

    # weights loaded / bias broadcast once, outside the unrolled recurrence
    whh0 = whh0_ref[...]
    wcat1 = wcat1_ref[...]
    b1 = jnp.broadcast_to(b1_ref[...], (batch, H))

    # hidden states carried in vregs (no per-step VMEM round trips)
    h1 = h0_ref[0]
    h2 = h0_ref[1]

    # fully unrolled recurrence (seq_len is a small static constant)
    h2_steps = []
    for t in range(seq_len):
        lo = t * batch
        # layer 0: only the recurrent matmul remains on the serial critical path
        h1 = jnp.maximum(
            xp[lo:lo + batch, :]
            + jnp.dot(h1, whh0, preferred_element_type=jnp.float32),
            0.0,
        )
        # layer 1: single fused dot [h1 | h2_prev] @ [wih1 ; whh1]
        hcat = jnp.concatenate([h1, h2], axis=1)               # (B, 2H)
        h2 = jnp.maximum(
            jnp.dot(hcat, wcat1, preferred_element_type=jnp.float32) + b1,
            0.0,
        )
        h2_steps.append(h2)

    hn_ref[0] = h1
    hn_ref[1] = h2

    # ---- fused, lane-dense output-head epilogue (off the critical path) ---
    h2_all = jnp.concatenate(h2_steps, axis=0)                  # (S*B, H), in vregs
    heads_ref[...] = (
        jnp.dot(h2_all, wh_ref[...], preferred_element_type=jnp.float32)
        + bh_ref[...]
    )


def _run_decoder_kernel(x_flat, h0, kp):
    """x_flat: (S*B, IN) time-major flattened, h0: (2, B, H)."""
    SB = x_flat.shape[0]
    B = h0.shape[1]
    S = SB // B
    H = HIDDEN_SIZE

    vmem = pl.BlockSpec(memory_space=pltpu.MemorySpace.VMEM)
    inputs = (
        x_flat, h0,
        kp["wih0"], kp["whh0"], kp["b0"],
        kp["wcat1"], kp["b1"],
        kp["wh"], kp["bh"],
    )
    out_shape = (
        jax.ShapeDtypeStruct((SB, HEADS_W), jnp.float32),   # fused heads
        jax.ShapeDtypeStruct((2, B, H), jnp.float32),       # h_n
    )

    flops = (
        2 * SB * IN_FEATURES * H            # hoisted input projection
        + S * (2 * B * H * H)               # layer-0 recurrent dot
        + S * (2 * B * (2 * H) * H)         # fused layer-1 dot
        + 2 * SB * H * HEADS_W              # head epilogue
    )
    bytes_accessed = 4 * (
        SB * IN_FEATURES + 2 * B * H                        # x, h0
        + IN_FEATURES * H + H * H + H                       # layer-0 params
        + 2 * H * H + H                                     # layer-1 params
        + H * HEADS_W + HEADS_W                             # head params
        + SB * HEADS_W + 2 * B * H                          # outputs
    )

    return pl.pallas_call(
        functools.partial(_decoder_kernel, S, B),
        out_shape=out_shape,
        in_specs=[vmem] * len(inputs),
        out_specs=(vmem, vmem),
        input_output_aliases={1: 1},        # h_0 buffer reused for h_n
        cost_estimate=pl.CostEstimate(
            flops=flops, transcendentals=0, bytes_accessed=bytes_accessed),
        compiler_params=pltpu.CompilerParams(
            vmem_limit_bytes=32 * 1024 * 1024),
    )(*inputs)


# ------------------ fused / packed parameter preparation --------------------
def prepare_kernel_params(params):
    """Fuse layer-1 weights and pack the 3 output heads into 256 lanes."""
    wcat1 = jnp.concatenate([params["wih1"], params["whh1"]], axis=0)   # (2H, H)
    wh = jnp.concatenate([params["wp"], params["ws"], params["wm"]], axis=1)  # (H, 210)
    bh = jnp.concatenate([params["bp"], params["bs"], params["bm"]], axis=1)  # (1, 210)
    pad = HEADS_W - N_HEADS * D_OUT
    wh = jnp.pad(wh, ((0, 0), (0, pad)))                                # (H, 256)
    bh = jnp.pad(bh, ((0, 0), (0, pad)))                                # (1, 256)
    return dict(
        wih0=params["wih0"], whh0=params["whh0"], b0=params["b0"],
        wcat1=wcat1, b1=params["b1"],
        wh=wh, bh=bh,
    )


# ------------------------------ wrapper (glue) ------------------------------
def action_decoder_forward(latent_plan, perceptual_emb, latent_goal, params,
                           h_0=None):
    """Mirrors ActionDecoder.forward.

    latent_plan:    (B, PLAN_FEATURES)
    perceptual_emb: (B, S, PERCEPTUAL_FEATURES)
    latent_goal:    (B, LATENT_GOAL_FEATURES)
    returns (logit_probs, log_scales, means, h_n) with shapes
      (B, S, OUT_FEATURES, N_DIST) x3 and (2, B, HIDDEN_SIZE).
    """
    B, S = perceptual_emb.shape[0], perceptual_emb.shape[1]
    plan = jnp.broadcast_to(latent_plan[:, None, :], (B, S, PLAN_FEATURES))
    goal = jnp.broadcast_to(latent_goal[:, None, :], (B, S, LATENT_GOAL_FEATURES))
    x = jnp.concatenate([plan, perceptual_emb, goal], axis=-1)       # (B, S, IN)
    x_flat = (jnp.transpose(x, (1, 0, 2))                            # (S, B, IN)
              .reshape(S * B, IN_FEATURES).astype(jnp.float32))      # (S*B, IN)

    if h_0 is None:
        h_0 = jnp.zeros((2, B, HIDDEN_SIZE), jnp.float32)
    h_0 = h_0.astype(jnp.float32)

    kp = prepare_kernel_params(params)
    heads, h_n = _run_decoder_kernel(x_flat, h_0, kp)

    def to_bsfd(col):   # slice head `col`, (S*B, D_OUT) -> (B, S, OUT, N_DIST)
        y = heads[:, col:col + D_OUT].reshape(S, B, D_OUT)
        return jnp.transpose(y, (1, 0, 2)).reshape(B, S, OUT_FEATURES, N_DIST)

    logit_probs = to_bsfd(0)
    log_scales = jnp.maximum(to_bsfd(D_OUT), LOG_SCALE_MIN)
    means = to_bsfd(2 * D_OUT)
    return logit_probs, log_scales, means, h_n


# -------------------- deterministic parameter construction ------------------
def make_params(key):
    ks = jax.random.split(key, 14)
    scale = 0.1

    def w(k, shape):
        return scale * jax.random.normal(k, shape, dtype=jnp.float32)

    # RNN layer 0 (PyTorch stores (H, in); we keep matmul-ready (in, H))
    wih0 = w(ks[0], (IN_FEATURES, HIDDEN_SIZE))
    whh0 = w(ks[1], (HIDDEN_SIZE, HIDDEN_SIZE))
    b0 = w(ks[2], (1, HIDDEN_SIZE)) + w(ks[3], (1, HIDDEN_SIZE))  # b_ih + b_hh
    # RNN layer 1
    wih1 = w(ks[4], (HIDDEN_SIZE, HIDDEN_SIZE))
    whh1 = w(ks[5], (HIDDEN_SIZE, HIDDEN_SIZE))
    b1 = w(ks[6], (1, HIDDEN_SIZE)) + w(ks[7], (1, HIDDEN_SIZE))
    # output heads (Linear weight (out, in) -> transposed to (in, out))
    wp, bp = w(ks[8], (HIDDEN_SIZE, D_OUT)), w(ks[9], (1, D_OUT))
    ws, bs = w(ks[10], (HIDDEN_SIZE, D_OUT)), w(ks[11], (1, D_OUT))
    wm, bm = w(ks[12], (HIDDEN_SIZE, D_OUT)), w(ks[13], (1, D_OUT))
    return dict(wih0=wih0, whh0=whh0, b0=b0, wih1=wih1, whh1=whh1, b1=b1,
                wp=wp, bp=bp, ws=ws, bs=bs, wm=wm, bm=bm)


# --------------------------- pure-JAX reference -----------------------------
def reference_forward(latent_plan, perceptual_emb, latent_goal, params):
    B, S = perceptual_emb.shape[0], perceptual_emb.shape[1]
    plan = jnp.broadcast_to(latent_plan[:, None, :], (B, S, PLAN_FEATURES))
    goal = jnp.broadcast_to(latent_goal[:, None, :], (B, S, LATENT_GOAL_FEATURES))
    x = jnp.concatenate([plan, perceptual_emb, goal], axis=-1)
    x = jnp.transpose(x, (1, 0, 2))  # (S, B, IN)

    def step(carry, x_t):
        h1, h2 = carry
        h1 = jax.nn.relu(x_t @ params["wih0"] + h1 @ params["whh0"] + params["b0"])
        h2 = jax.nn.relu(h1 @ params["wih1"] + h2 @ params["whh1"] + params["b1"])
        return (h1, h2), h2

    h_init = (jnp.zeros((B, HIDDEN_SIZE)), jnp.zeros((B, HIDDEN_SIZE)))
    (h1_n, h2_n), hs = lax.scan(step, h_init, x)          # hs: (S, B, H)
    probs = hs @ params["wp"] + params["bp"]
    means = hs @ params["wm"] + params["bm"]
    log_scales = jnp.maximum(hs @ params["ws"] + params["bs"], LOG_SCALE_MIN)

    def to_bsfd(y):
        return jnp.transpose(y, (1, 0, 2)).reshape(B, S, OUT_FEATURES, N_DIST)

    h_n = jnp.stack([h1_n, h2_n], axis=0)
    return to_bsfd(probs), to_bsfd(log_scales), to_bsfd(means), h_n


# ----------------------------------- main -----------------------------------
if __name__ == "__main__":
    key = jax.random.PRNGKey(0)
    k_par, k_plan, k_perc, k_goal = jax.random.split(key, 4)

    B, S = 2, 8
    params = make_params(k_par)
    latent_plan = jax.random.normal(k_plan, (B, PLAN_FEATURES), dtype=jnp.float32)
    perceptual_emb = jax.random.normal(
        k_perc, (B, S, PERCEPTUAL_FEATURES), dtype=jnp.float32)
    latent_goal = jax.random.normal(
        k_goal, (B, LATENT_GOAL_FEATURES), dtype=jnp.float32)

    outs = action_decoder_forward(latent_plan, perceptual_emb, latent_goal, params)
    outs = jax.block_until_ready(outs)
    logit_probs, log_scales, means, h_n = outs

    # sanity check against a pure-JAX reference
    ref = reference_forward(latent_plan, perceptual_emb, latent_goal, params)
    for got, want in zip(outs, ref):
        assert got.shape == want.shape, (got.shape, want.shape)
        assert jnp.allclose(got, want, atol=1e-4, rtol=1e-4), "mismatch vs reference"

    assert logit_probs.shape == (B, S, OUT_FEATURES, N_DIST)
    assert log_scales.shape == (B, S, OUT_FEATURES, N_DIST)
    assert means.shape == (B, S, OUT_FEATURES, N_DIST)
    assert h_n.shape == (2, B, HIDDEN_SIZE)
    assert float(jnp.min(log_scales)) >= LOG_SCALE_MIN - 1e-6

    print("KERNEL_OK")
</pallas_src>

<mosaic_0001>
module attributes {stable_mosaic.version = 11 : i64} {
  func.func @_decoder_kernel(%arg0: memref<16x80xf32, #tpu.memory_space<vmem>>, %arg1: memref<2x2x32xf32, #tpu.memory_space<vmem>>, %arg2: memref<80x32xf32, #tpu.memory_space<vmem>>, %arg3: memref<32x32xf32, #tpu.memory_space<vmem>>, %arg4: memref<1x32xf32, #tpu.memory_space<vmem>>, %arg5: memref<64x32xf32, #tpu.memory_space<vmem>>, %arg6: memref<1x32xf32, #tpu.memory_space<vmem>>, %arg7: memref<32x256xf32, #tpu.memory_space<vmem>>, %arg8: memref<1x256xf32, #tpu.memory_space<vmem>>, %arg9: memref<16x256xf32, #tpu.memory_space<vmem>>, %arg10: memref<2x2x32xf32, #tpu.memory_space<vmem>>) attributes {dimension_semantics = [], scalar_prefetch = 0 : i64, scratch_operands = 0 : i64, tpu.core_type = #tpu.core_type<tc>} {
    %c0 = arith.constant 0 : index
    %c0_0 = arith.constant 0 : index
    %0 = vector.load %arg0[%c0, %c0_0] : memref<16x80xf32, #tpu.memory_space<vmem>>, vector<16x80xf32>
    %c0_1 = arith.constant 0 : index
    %c0_2 = arith.constant 0 : index
    %1 = vector.load %arg2[%c0_1, %c0_2] : memref<80x32xf32, #tpu.memory_space<vmem>>, vector<80x32xf32>
    %cst = arith.constant dense<0.000000e+00> : vector<16x32xf32>
    %2 = tpu.matmul %0, %1, %cst {dimension_numbers = #tpu.dot_dimension_numbers<[1], [0], [0], [1], [0, 0, 1, 1], [], []>} : vector<16x80xf32>, vector<80x32xf32>, vector<16x32xf32> -> vector<16x32xf32>
    %c0_3 = arith.constant 0 : index
    %c0_4 = arith.constant 0 : index
    %3 = vector.load %arg4[%c0_3, %c0_4] : memref<1x32xf32, #tpu.memory_space<vmem>>, vector<1x32xf32>
    %4 = vector.broadcast %3 : vector<1x32xf32> to vector<16x32xf32>
    %5 = arith.addf %2, %4 : vector<16x32xf32>
    %c0_5 = arith.constant 0 : index
    %c0_6 = arith.constant 0 : index
    %6 = vector.load %arg3[%c0_5, %c0_6] : memref<32x32xf32, #tpu.memory_space<vmem>>, vector<32x32xf32>
    %c0_7 = arith.constant 0 : index
    %c0_8 = arith.constant 0 : index
    %7 = vector.load %arg5[%c0_7, %c0_8] : memref<64x32xf32, #tpu.memory_space<vmem>>, vector<64x32xf32>
    %c0_9 = arith.constant 0 : index
    %c0_10 = arith.constant 0 : index
    %8 = vector.load %arg6[%c0_9, %c0_10] : memref<1x32xf32, #tpu.memory_space<vmem>>, vector<1x32xf32>
    %9 = vector.shape_cast %8 : vector<1x32xf32> to vector<1x32xf32>
    %10 = vector.broadcast %9 : vector<1x32xf32> to vector<2x32xf32>
    %c0_11 = arith.constant 0 : index
    %c0_12 = arith.constant 0 : index
    %c0_13 = arith.constant 0 : index
    %11 = vector.load %arg1[%c0_11, %c0_12, %c0_13] : memref<2x2x32xf32, #tpu.memory_space<vmem>>, vector<1x2x32xf32>
    %12 = vector.shape_cast %11 : vector<1x2x32xf32> to vector<2x32xf32>
    %c1 = arith.constant 1 : index
    %c0_14 = arith.constant 0 : index
    %c0_15 = arith.constant 0 : index
    %13 = vector.load %arg1[%c1, %c0_14, %c0_15] : memref<2x2x32xf32, #tpu.memory_space<vmem>>, vector<1x2x32xf32>
    %14 = vector.shape_cast %13 : vector<1x2x32xf32> to vector<2x32xf32>
    %15 = vector.extract_strided_slice %5 {offsets = [0, 0], sizes = [2, 32], strides = [1, 1]} : vector<16x32xf32> to vector<2x32xf32>
    %cst_16 = arith.constant dense<0.000000e+00> : vector<2x32xf32>
    %16 = tpu.matmul %12, %6, %cst_16 {dimension_numbers = #tpu.dot_dimension_numbers<[1], [0], [0], [1], [0, 0, 1, 1], [], []>} : vector<2x32xf32>, vector<32x32xf32>, vector<2x32xf32> -> vector<2x32xf32>
    %17 = arith.addf %15, %16 : vector<2x32xf32>
    %cst_17 = arith.constant 0.000000e+00 : f32
    %18 = vector.broadcast %cst_17 : f32 to vector<2x32xf32>
    %19 = arith.maximumf %17, %18 : vector<2x32xf32>
    %20 = tpu.concatenate %19, %14 in 1 : vector<2x32xf32>, vector<2x32xf32> -> vector<2x64xf32>
    %cst_18 = arith.constant dense<0.000000e+00> : vector<2x32xf32>
    %21 = tpu.matmul %20, %7, %cst_18 {dimension_numbers = #tpu.dot_dimension_numbers<[1], [0], [0], [1], [0, 0, 1, 1], [], []>} : vector<2x64xf32>, vector<64x32xf32>, vector<2x32xf32> -> vector<2x32xf32>
    %22 = arith.addf %21, %10 : vector<2x32xf32>
    %cst_19 = arith.constant 0.000000e+00 : f32
    %23 = vector.broadcast %cst_19 : f32 to vector<2x32xf32>
    %24 = arith.maximumf %22, %23 : vector<2x32xf32>
    %25 = vector.extract_strided_slice %5 {offsets = [2, 0], sizes = [2, 32], strides = [1, 1]} : vector<16x32xf32> to vector<2x32xf32>
    %cst_20 = arith.constant dense<0.000000e+00> : vector<2x32xf32>
    %26 = tpu.matmul %19, %6, %cst_20 {dimension_numbers = #tpu.dot_dimension_numbers<[1], [0], [0], [1], [0, 0, 1, 1], [], []>} : vector<2x32xf32>, vector<32x32xf32>, vector<2x32xf32> -> vector<2x32xf32>
    %27 = arith.addf %25, %26 : vector<2x32xf32>
    %cst_21 = arith.constant 0.000000e+00 : f32
    %28 = vector.broadcast %cst_21 : f32 to vector<2x32xf32>
    %29 = arith.maximumf %27, %28 : vector<2x32xf32>
    %30 = tpu.concatenate %29, %24 in 1 : vector<2x32xf32>, vector<2x32xf32> -> vector<2x64xf32>
    %cst_22 = arith.constant dense<0.000000e+00> : vector<2x32xf32>
    %31 = tpu.matmul %30, %7, %cst_22 {dimension_numbers = #tpu.dot_dimension_numbers<[1], [0], [0], [1], [0, 0, 1, 1], [], []>} : vector<2x64xf32>, vector<64x32xf32>, vector<2x32xf32> -> vector<2x32xf32>
    %32 = arith.addf %31, %10 : vector<2x32xf32>
    %cst_23 = arith.constant 0.000000e+00 : f32
    %33 = vector.broadcast %cst_23 : f32 to vector<2x32xf32>
    %34 = arith.maximumf %32, %33 : vector<2x32xf32>
    %35 = vector.extract_strided_slice %5 {offsets = [4, 0], sizes = [2, 32], strides = [1, 1]} : vector<16x32xf32> to vector<2x32xf32>
    %cst_24 = arith.constant dense<0.000000e+00> : vector<2x32xf32>
    %36 = tpu.matmul %29, %6, %cst_24 {dimension_numbers = #tpu.dot_dimension_numbers<[1], [0], [0], [1], [0, 0, 1, 1], [], []>} : vector<2x32xf32>, vector<32x32xf32>, vector<2x32xf32> -> vector<2x32xf32>
    %37 = arith.addf %35, %36 : vector<2x32xf32>
    %cst_25 = arith.constant 0.000000e+00 : f32
    %38 = vector.broadcast %cst_25 : f32 to vector<2x32xf32>
    %39 = arith.maximumf %37, %38 : vector<2x32xf32>
    %40 = tpu.concatenate %39, %34 in 1 : vector<2x32xf32>, vector<2x32xf32> -> vector<2x64xf32>
    %cst_26 = arith.constant dense<0.000000e+00> : vector<2x32xf32>
    %41 = tpu.matmul %40, %7, %cst_26 {dimension_numbers = #tpu.dot_dimension_numbers<[1], [0], [0], [1], [0, 0, 1, 1], [], []>} : vector<2x64xf32>, vector<64x32xf32>, vector<2x32xf32> -> vector<2x32xf32>
    %42 = arith.addf %41, %10 : vector<2x32xf32>
    %cst_27 = arith.constant 0.000000e+00 : f32
    %43 = vector.broadcast %cst_27 : f32 to vector<2x32xf32>
    %44 = arith.maximumf %42, %43 : vector<2x32xf32>
    %45 = vector.extract_strided_slice %5 {offsets = [6, 0], sizes = [2, 32], strides = [1, 1]} : vector<16x32xf32> to vector<2x32xf32>
    %cst_28 = arith.constant dense<0.000000e+00> : vector<2x32xf32>
    %46 = tpu.matmul %39, %6, %cst_28 {dimension_numbers = #tpu.dot_dimension_numbers<[1], [0], [0], [1], [0, 0, 1, 1], [], []>} : vector<2x32xf32>, vector<32x32xf32>, vector<2x32xf32> -> vector<2x32xf32>
    %47 = arith.addf %45, %46 : vector<2x32xf32>
    %cst_29 = arith.constant 0.000000e+00 : f32
    %48 = vector.broadcast %cst_29 : f32 to vector<2x32xf32>
    %49 = arith.maximumf %47, %48 : vector<2x32xf32>
    %50 = tpu.concatenate %49, %44 in 1 : vector<2x32xf32>, vector<2x32xf32> -> vector<2x64xf32>
    %cst_30 = arith.constant dense<0.000000e+00> : vector<2x32xf32>
    %51 = tpu.matmul %50, %7, %cst_30 {dimension_numbers = #tpu.dot_dimension_numbers<[1], [0], [0], [1], [0, 0, 1, 1], [], []>} : vector<2x64xf32>, vector<64x32xf32>, vector<2x32xf32> -> vector<2x32xf32>
    %52 = arith.addf %51, %10 : vector<2x32xf32>
    %cst_31 = arith.constant 0.000000e+00 : f32
    %53 = vector.broadcast %cst_31 : f32 to vector<2x32xf32>
    %54 = arith.maximumf %52, %53 : vector<2x32xf32>
    %55 = vector.extract_strided_slice %5 {offsets = [8, 0], sizes = [2, 32], strides = [1, 1]} : vector<16x32xf32> to vector<2x32xf32>
    %cst_32 = arith.constant dense<0.000000e+00> : vector<2x32xf32>
    %56 = tpu.matmul %49, %6, %cst_32 {dimension_numbers = #tpu.dot_dimension_numbers<[1], [0], [0], [1], [0, 0, 1, 1], [], []>} : vector<2x32xf32>, vector<32x32xf32>, vector<2x32xf32> -> vector<2x32xf32>
    %57 = arith.addf %55, %56 : vector<2x32xf32>
    %cst_33 = arith.constant 0.000000e+00 : f32
    %58 = vector.broadcast %cst_33 : f32 to vector<2x32xf32>
    %59 = arith.maximumf %57, %58 : vector<2x32xf32>
    %60 = tpu.concatenate %59, %54 in 1 : vector<2x32xf32>, vector<2x32xf32> -> vector<2x64xf32>
    %cst_34 = arith.constant dense<0.000000e+00> : vector<2x32xf32>
    %61 = tpu.matmul %60, %7, %cst_34 {dimension_numbers = #tpu.dot_dimension_numbers<[1], [0], [0], [1], [0, 0, 1, 1], [], []>} : vector<2x64xf32>, vector<64x32xf32>, vector<2x32xf32> -> vector<2x32xf32>
    %62 = arith.addf %61, %10 : vector<2x32xf32>
    %cst_35 = arith.constant 0.000000e+00 : f32
    %63 = vector.broadcast %cst_35 : f32 to vector<2x32xf32>
    %64 = arith.maximumf %62, %63 : vector<2x32xf32>
    %65 = vector.extract_strided_slice %5 {offsets = [10, 0], sizes = [2, 32], strides = [1, 1]} : vector<16x32xf32> to vector<2x32xf32>
    %cst_36 = arith.constant dense<0.000000e+00> : vector<2x32xf32>
    %66 = tpu.matmul %59, %6, %cst_36 {dimension_numbers = #tpu.dot_dimension_numbers<[1], [0], [0], [1], [0, 0, 1, 1], [], []>} : vector<2x32xf32>, vector<32x32xf32>, vector<2x32xf32> -> vector<2x32xf32>
    %67 = arith.addf %65, %66 : vector<2x32xf32>
    %cst_37 = arith.constant 0.000000e+00 : f32
    %68 = vector.broadcast %cst_37 : f32 to vector<2x32xf32>
    %69 = arith.maximumf %67, %68 : vector<2x32xf32>
    %70 = tpu.concatenate %69, %64 in 1 : vector<2x32xf32>, vector<2x32xf32> -> vector<2x64xf32>
    %cst_38 = arith.constant dense<0.000000e+00> : vector<2x32xf32>
    %71 = tpu.matmul %70, %7, %cst_38 {dimension_numbers = #tpu.dot_dimension_numbers<[1], [0], [0], [1], [0, 0, 1, 1], [], []>} : vector<2x64xf32>, vector<64x32xf32>, vector<2x32xf32> -> vector<2x32xf32>
    %72 = arith.addf %71, %10 : vector<2x32xf32>
    %cst_39 = arith.constant 0.000000e+00 : f32
    %73 = vector.broadcast %cst_39 : f32 to vector<2x32xf32>
    %74 = arith.maximumf %72, %73 : vector<2x32xf32>
    %75 = vector.extract_strided_slice %5 {offsets = [12, 0], sizes = [2, 32], strides = [1, 1]} : vector<16x32xf32> to vector<2x32xf32>
    %cst_40 = arith.constant dense<0.000000e+00> : vector<2x32xf32>
    %76 = tpu.matmul %69, %6, %cst_40 {dimension_numbers = #tpu.dot_dimension_numbers<[1], [0], [0], [1], [0, 0, 1, 1], [], []>} : vector<2x32xf32>, vector<32x32xf32>, vector<2x32xf32> -> vector<2x32xf32>
    %77 = arith.addf %75, %76 : vector<2x32xf32>
    %cst_41 = arith.constant 0.000000e+00 : f32
    %78 = vector.broadcast %cst_41 : f32 to vector<2x32xf32>
    %79 = arith.maximumf %77, %78 : vector<2x32xf32>
    %80 = tpu.concatenate %79, %74 in 1 : vector<2x32xf32>, vector<2x32xf32> -> vector<2x64xf32>
    %cst_42 = arith.constant dense<0.000000e+00> : vector<2x32xf32>
    %81 = tpu.matmul %80, %7, %cst_42 {dimension_numbers = #tpu.dot_dimension_numbers<[1], [0], [0], [1], [0, 0, 1, 1], [], []>} : vector<2x64xf32>, vector<64x32xf32>, vector<2x32xf32> -> vector<2x32xf32>
    %82 = arith.addf %81, %10 : vector<2x32xf32>
    %cst_43 = arith.constant 0.000000e+00 : f32
    %83 = vector.broadcast %cst_43 : f32 to vector<2x32xf32>
    %84 = arith.maximumf %82, %83 : vector<2x32xf32>
    %85 = vector.extract_strided_slice %5 {offsets = [14, 0], sizes = [2, 32], strides = [1, 1]} : vector<16x32xf32> to vector<2x32xf32>
    %cst_44 = arith.constant dense<0.000000e+00> : vector<2x32xf32>
    %86 = tpu.matmul %79, %6, %cst_44 {dimension_numbers = #tpu.dot_dimension_numbers<[1], [0], [0], [1], [0, 0, 1, 1], [], []>} : vector<2x32xf32>, vector<32x32xf32>, vector<2x32xf32> -> vector<2x32xf32>
    %87 = arith.addf %85, %86 : vector<2x32xf32>
    %cst_45 = arith.constant 0.000000e+00 : f32
    %88 = vector.broadcast %cst_45 : f32 to vector<2x32xf32>
    %89 = arith.maximumf %87, %88 : vector<2x32xf32>
    %90 = tpu.concatenate %89, %84 in 1 : vector<2x32xf32>, vector<2x32xf32> -> vector<2x64xf32>
    %cst_46 = arith.constant dense<0.000000e+00> : vector<2x32xf32>
    %91 = tpu.matmul %90, %7, %cst_46 {dimension_numbers = #tpu.dot_dimension_numbers<[1], [0], [0], [1], [0, 0, 1, 1], [], []>} : vector<2x64xf32>, vector<64x32xf32>, vector<2x32xf32> -> vector<2x32xf32>
    %92 = arith.addf %91, %10 : vector<2x32xf32>
    %cst_47 = arith.constant 0.000000e+00 : f32
    %93 = vector.broadcast %cst_47 : f32 to vector<2x32xf32>
    %94 = arith.maximumf %92, %93 : vector<2x32xf32>
    %c0_48 = arith.constant 0 : index
    %c0_49 = arith.constant 0 : index
    %c0_50 = arith.constant 0 : index
    %95 = vector.load %arg10[%c0_48, %c0_49, %c0_50] : memref<2x2x32xf32, #tpu.memory_space<vmem>>, vector<1x2x32xf32>
    %96 = vector.shape_cast %95 : vector<1x2x32xf32> to vector<2x32xf32>
    %97 = vector.shape_cast %89 : vector<2x32xf32> to vector<1x2x32xf32>
    tpu.vector_store %arg10[%c0_48, %c0_49, %c0_50], %97 {strides = array<i32>} : memref<2x2x32xf32, #tpu.memory_space<vmem>>, vector<1x2x32xf32>,
    %c1_51 = arith.constant 1 : index
    %c0_52 = arith.constant 0 : index
    %c0_53 = arith.constant 0 : index
    %98 = vector.load %arg10[%c1_51, %c0_52, %c0_53] : memref<2x2x32xf32, #tpu.memory_space<vmem>>, vector<1x2x32xf32>
    %99 = vector.shape_cast %98 : vector<1x2x32xf32> to vector<2x32xf32>
    %100 = vector.shape_cast %94 : vector<2x32xf32> to vector<1x2x32xf32>
    tpu.vector_store %arg10[%c1_51, %c0_52, %c0_53], %100 {strides = array<i32>} : memref<2x2x32xf32, #tpu.memory_space<vmem>>, vector<1x2x32xf32>,
    %101 = tpu.concatenate %24, %34, %44, %54, %64, %74, %84, %94 in 0 : vector<2x32xf32>, vector<2x32xf32>, vector<2x32xf32>, vector<2x32xf32>, vector<2x32xf32>, vector<2x32xf32>, vector<2x32xf32>, vector<2x32xf32> -> vector<16x32xf32>
    %c0_54 = arith.constant 0 : index
    %c0_55 = arith.constant 0 : index
    %102 = vector.load %arg7[%c0_54, %c0_55] : memref<32x256xf32, #tpu.memory_space<vmem>>, vector<32x256xf32>
    %cst_56 = arith.constant dense<0.000000e+00> : vector<16x256xf32>
    %103 = tpu.matmul %101, %102, %cst_56 {dimension_numbers = #tpu.dot_dimension_numbers<[1], [0], [0], [1], [0, 0, 1, 1], [], []>} : vector<16x32xf32>, vector<32x256xf32>, vector<16x256xf32> -> vector<16x256xf32>
    %c0_57 = arith.constant 0 : index
    %c0_58 = arith.constant 0 : index
    %104 = vector.load %arg8[%c0_57, %c0_58] : memref<1x256xf32, #tpu.memory_space<vmem>>, vector<1x256xf32>
    %105 = vector.broadcast %104 : vector<1x256xf32> to vector<16x256xf32>
    %106 = arith.addf %103, %105 : vector<16x256xf32>
    %c0_59 = arith.constant 0 : index
    %c0_60 = arith.constant 0 : index
    %107 = vector.load %arg9[%c0_59, %c0_60] : memref<16x256xf32, #tpu.memory_space<vmem>>, vector<16x256xf32>
    tpu.vector_store %arg9[%c0_59, %c0_60], %106 {strides = array<i32>} : memref<16x256xf32, #tpu.memory_space<vmem>>, vector<16x256xf32>,
    return
  }
}

</mosaic_0001>

<bundles_post_ra>
// kernel: tpu_custom_call.1
= control target key start
LH: loop header
LB: loop body
LE: loop exit
PB: predicated region body
PF: predicated region fallthrough
CT: control target
= control target key end

     0   :  { %16 = vsyncpa [#allocation3], 0  ;;  %s1219_s0 = inlined_call_operand.vmem [shape: f32[16,80], index: 0, kind: input, shape index: {}]   ;;  %s1220_s1 = inlined_call_operand.hbm [shape: f32[2,2,32], index: 1, kind: input, shape index: {}, may-alias: {1,10}]   ;;  %s1221_s2 = inlined_call_operand.vmem [shape: f32[80,32], index: 2, kind: input, shape index: {}]   ;;  %s1222_s3 = inlined_call_operand.vmem [shape: f32[32,32], index: 3, kind: input, shape index: {}]   ;;  %s1223_s4 = inlined_call_operand.vmem [shape: f32[1,32], index: 4, kind: input, shape index: {}]   ;;  %s1224_s5 = inlined_call_operand.vmem [shape: f32[64,32], index: 5, kind: input, shape index: {}]   ;;  %s1225_s6 = inlined_call_operand.vmem [shape: f32[1,32], index: 6, kind: input, shape index: {}]   ;;  %s1226_s7 = inlined_call_operand.vmem [shape: f32[32,256], index: 7, kind: input, shape index: {}]   ;;  %s1227_s8 = inlined_call_operand.vmem [shape: f32[1,256], index: 8, kind: input, shape index: {}]   ;;  %s1228_s9 = inlined_call_operand.hbm [shape: f32[16,256], index: 9, kind: output, shape index: {0}]   ;;  %s1229_s10 = inlined_call_operand.hbm [shape: f32[2,2,32], index: 10, kind: output, shape index: {1}, may-alias: {1,10}]  }
   0x1   :  { %17 = vsyncpa [#allocation4], 0 }
   0x2   :  { %18 = vsyncpa [#allocation7], 0  ;;  %s25_s15 = sshll.u32 %s1220_s1, 4  ;;  %s829_s16 = smov [#allocation2]   ;;  %s26_s15 = int_to_ptr.hbm [resolvable:$true] %s25_s15 }
   0x3   :  { %s27_s17 = sshll.u32 %s829_s16, 4  ;;  %s830_s18 = smov 32   ;;  %s28_s17 = int_to_ptr.vmem [resolvable:$true] %s27_s17 }
   0x4   :  { %s831_s19 = smov 2  }
   0x5   :  { %33 = dma.hbm_to_vmem [thread:$0]  %s26_s15, 64, %s28_s17, [#allocation3], %s830_s18, %s830_s18, %s831_s19  }
   0x6   :  { %823 = dma.done.wait [#allocation3], 64  }
   0x7   :  { %824 = vsyncadd [#allocation3], 4294967232  ;;  %v63_v0 = vld [vmem:[%s1221_s2 + $0x48] sm:$0xff]  ;;  %v62_v1 = vld [vmem:[%s1221_s2 + $0x40] sm:$0xff]  ;;  %vm117_vm0 = vcmask 261120   ;;  %vm68_vm1 = vcmask 654336  }
   0x8   :  { %81 = vmatpush.msra.mxu0 %v63_v0  ;;  %v61_v2 = vld [vmem:[%s1221_s2 + $0x38] sm:$0xff]  ;;  %v915_v4 = vld [vmem:[%s1222_s3 + $0x10] sm:$0xff]  ;;  %v923_v6 = vld [vmem:[%s1222_s3 + $0x8] sm:$0xff]  ;;  %vm148_vm2 = vcmask 523264   ;;  %vm604_vm3 = vcmask 1041408   ;;  %vm606_vm4 = vcmask 1043456  }
   0x9   :  { %v909_v3 = vld [vmem:[%s1222_s3 + $0x18] sm:$0xff]  ;;  %v60_v5 = vld [vmem:[%s1221_s2 + $0x30] sm:$0xff]  ;;  %v59_v7 = vld [vmem:[%s1221_s2 + $0x28] sm:$0xff]  ;;  %vm608_vm5 = vcmask 1045504   ;;  %vm586_vm6 = vcmask 261126   ;;  %vm589_vm7 = vcmask 254976  }
   0xa   :  { %82 = vmatpush.msra.mxu0 %v62_v1  ;;  %133 = vmatpush.msra.mxu1 %v909_v3  ;;  %v116_v8 = vld [vmem:[#allocation2 + $0x2] sm:$0x3]  ;;  %v933_v9 = vld [vmem:[%s1224_s5 + $0x38] sm:$0xff]  ;;  %v114_v11 = vld [vmem:[#allocation2] sm:$0x3]  ;;  %s702_s24 = sshll.u32 %s1229_s10, 4  ;;  %s703_s24 = int_to_ptr.hbm [resolvable:$true] %s702_s24 }
   0xb   :  { %188 = vmatpush.msra.mxu3 %v909_v3  ;;  %v938_v10 = vld [vmem:[%s1222_s3] sm:$0xff]  ;;  %144 = vrot.lane.b32.xlu0 %v116_v8, %s830_s18  ;;  %v945_v12 = vld [vmem:[%s1224_s5 + $0x30] sm:$0xff]  ;;  %v951_v13 = vld [vmem:[%s1224_s5 + $0x28] sm:$0xff]  ;;  %s834_s10 = smov 256   ;;  %s835_s27 = smov 16  }
   0xc   :  { %83 = vmatpush.msra.mxu0 %v61_v2  ;;  %134 = vmatpush.msra.mxu1 %v915_v4  ;;  %v58_v14 = vld [vmem:[%s1221_s2 + $0x20] sm:$0xff]  ;;  %v57_v16 = vld [vmem:[%s1221_s2 + $0x18] sm:$0xff]  ;;  %v56_v17 = vld [vmem:[%s1221_s2 + $0x10] sm:$0xff] }
   0xd   :  { %160 = vmatpush.msra.mxu2 %v933_v9  ;;  %189 = vmatpush.msra.mxu3 %v915_v4  ;;  %v962_v15 = vld [vmem:[%s1224_s5 + $0x20] sm:$0xff]  ;;  %v55_v18 = vld [vmem:[%s1221_s2 + $0x8] sm:$0xff]  ;;  %v1000_v21 = vld [vmem:[%s1224_s5 + $0x18] sm:$0xff] }
   0xe   :  { %84 = vmatpush.msra.mxu0 %v60_v5  ;;  %135 = vmatpush.msra.mxu1 %v923_v6  ;;  %v54_v19 = vld [vmem:[%s1221_s2] sm:$0xff]  ;;  %v1007_v22 = vld [vmem:[%s1224_s5 + $0x10] sm:$0xff]  ;;  %v1015_v23 = vld [vmem:[%s1224_s5 + $0x8] sm:$0xff] }
   0xf   :  { %161 = vmatpush.msra.mxu2 %v945_v12  ;;  %190 = vmatpush.msra.mxu3 %v923_v6  ;;  %v52_v20 = vld [vmem:[%s1219_s0] sm:$0xff]  ;;  %v53_v54 = vld [vmem:[%s1219_s0 + $0x8] sm:$0xff]  ;;  %s689_s0 = sshll.u32 %s1228_s9, 4  ;;  %s690_s0 = int_to_ptr.hbm [resolvable:$true] %s689_s0 }
  0x10   :  { %85 = vmatpush.msra.mxu0 %v59_v7  ;;  %136 = vmatpush.msra.mxu1 %v938_v10  ;;  %v1022_v24 = vld [vmem:[%s1224_s5] sm:$0xff] }
  0x11   :  { %722 = vmatmul.msk.f32.vlgmr.msra.gmra.mxu1 %vm117_vm0, %v114_v11  ;;  %162 = vmatpush.msra.mxu2 %v951_v13  ;;  %v1048_v25 = vld [vmem:[%s1223_s4] ss:$0 sm:$0xff]  ;;  %s833_s4 = smov [#allocation5]  }
  0x12   :  { %86 = vmatpush.msra.mxu0 %v58_v14  ;;  %219 = vmatpush.msrb.mxu1 %v933_v9  ;;  %v1072_v33 = vld [vmem:[%s1225_s6] ss:$0 sm:$0xff]  ;;  %s687_s25 = sshll.u32 %s833_s4, 4  ;;  %s688_s25 = int_to_ptr.vmem [resolvable:$true] %s687_s25 }
  0x13   :  { %163 = vmatpush.msra.mxu2 %v962_v15  ;;  %191 = vmatpush.msra.mxu3 %v938_v10 }
  0x14   :  { %87 = vmatpush.msra.mxu0 %v57_v16  ;;  %220 = vmatpush.msrb.mxu1 %v945_v12 }
  0x15   :  { %248 = vmatpush.msrb.mxu3 %v909_v3  ;;  %164 = vmatpush.msra.mxu2 %v1000_v21 }
  0x16   :  { %88 = vmatpush.msra.mxu0 %v56_v17  ;;  %221 = vmatpush.msrb.mxu1 %v951_v13 }
  0x17   :  { %249 = vmatpush.msrb.mxu3 %v915_v4  ;;  %165 = vmatpush.msra.mxu2 %v1007_v22 }
  0x18   :  { %89 = vmatpush.msra.mxu0 %v55_v18  ;;  %222 = vmatpush.msrb.mxu1 %v962_v15 }
  0x19   :  { %250 = vmatpush.msrb.mxu3 %v923_v6  ;;  %166 = vmatpush.msra.mxu2 %v1015_v23 }
  0x1a   :  { %90 = vmatpush.msra.mxu0 %v54_v19  ;;  %223 = vmatpush.msrb.mxu1 %v1000_v21 }
  0x1b   :  { %720 = vmatmul.msk.f32.vlgmr.msra.gmra.mxu0 %vm68_vm1, %v52_v20  ;;  %251 = vmatpush.msrb.mxu3 %v938_v10 }
  0x1c   :  { %339 = vmatpush.msrb.mxu0 %v933_v9  ;;  %224 = vmatpush.msrb.mxu1 %v1007_v22 }
  0x1d   :  { %167 = vmatpush.msra.mxu2 %v1022_v24 }
  0x1e   :  { %340 = vmatpush.msrb.mxu0 %v945_v12  ;;  %225 = vmatpush.msrb.mxu1 %v1015_v23 }
  0x1f   :  { %279 = vmatpush.msrb.mxu2 %v933_v9 }
  0x20   :  { %341 = vmatpush.msrb.mxu0 %v951_v13  ;;  %226 = vmatpush.msrb.mxu1 %v1022_v24 }
  0x21   :  { %280 = vmatpush.msrb.mxu2 %v945_v12 }
  0x22   :  { %342 = vmatpush.msrb.mxu0 %v962_v15  ;;  %368 = vmatpush.msra.mxu1 %v909_v3 }
  0x23   :  { %281 = vmatpush.msrb.mxu2 %v951_v13  ;;  %721 = vmatmul.msk.f32.gmra.mxu0 %vm68_vm1, %v53_v54 }
  0x24   :  { %343 = vmatpush.msrb.mxu0 %v1000_v21  ;;  %369 = vmatpush.msra.mxu1 %v915_v4 }
  0x25   :  { %282 = vmatpush.msrb.mxu2 %v962_v15 }
  0x26   :  { %344 = vmatpush.msrb.mxu0 %v1007_v22  ;;  %370 = vmatpush.msra.mxu1 %v923_v6 }
  0x27   :  { %283 = vmatpush.msrb.mxu2 %v1000_v21 }
  0x28   :  { %345 = vmatpush.msrb.mxu0 %v1015_v23  ;;  %371 = vmatpush.msra.mxu1 %v938_v10 }
  0x29   :  { %284 = vmatpush.msrb.mxu2 %v1007_v22 }
  0x2a   :  { %346 = vmatpush.msrb.mxu0 %v1022_v24 }
  0x2b   :  { %285 = vmatpush.msrb.mxu2 %v1015_v23 }
  0x2c   :  { %482 = vmatpush.msra.mxu0 %v909_v3 }
  0x2d   :  { %286 = vmatpush.msrb.mxu2 %v1022_v24 }
  0x2e   :  { %483 = vmatpush.msra.mxu0 %v915_v4 }
  0x30   :  { %484 = vmatpush.msra.mxu0 %v923_v6 }
  0x32   :  { %485 = vmatpush.msra.mxu0 %v938_v10 }
  0x7d   :  { %v145_v30 = vpop.permute.xlu0 %144 }
  0x8e   :  { %v138_v27 = vpop.f32.mrf.mxu1 }
  0x98   :  { %v92_v26 = vpop.f32.mrf.mxu0 }
  0x99   :  { %v1051_v28 = vadd.f32 %v1048_v25, %v92_v26 }
  0x9b   :  { %v141_v29 = vadd.f32 %v138_v27, %v1051_v28 }
  0x9d   :  { %v142_v31 = vmax.f32 %v141_v29, 0.0 }
  0x9f   :  { %724 = vmatmul.msk.f32.vlgmr.msra.gmra.mxu3 %vm117_vm0, %v142_v31  ;;  %v147_v32 = vsel %vm117_vm0, %v142_v31, %v145_v30 }
  0xa0   :  { %723 = vmatmul.msk.f32.vlgmr.msra.gmra.mxu2 %vm148_vm2, %v147_v32  ;;  %308 = vmatpush.msra.mxu3 %v909_v3  ;;  %v95_v0 = vpop.f32.mrf.mxu0 }
  0xa1   :  { %453 = vmatpush.msra.mxu2 %v933_v9  ;;  %v1122_v1 = vadd.f32 %v1048_v25, %v95_v0 }
  0xa2   :  { %309 = vmatpush.msra.mxu3 %v915_v4 }
  0xa3   :  { %454 = vmatpush.msra.mxu2 %v945_v12 }
  0xa4   :  { %310 = vmatpush.msra.mxu3 %v923_v6 }
  0xa5   :  { %455 = vmatpush.msra.mxu2 %v951_v13 }
  0xa6   :  { %311 = vmatpush.msra.mxu3 %v938_v10 }
  0xa7   :  { %456 = vmatpush.msra.mxu2 %v962_v15 }
  0xa9   :  { %457 = vmatpush.msra.mxu2 %v1000_v21 }
  0xab   :  { %458 = vmatpush.msra.mxu2 %v1007_v22 }
  0xad   :  { %459 = vmatpush.msra.mxu2 %v1015_v23 }
  0xaf   :  { %460 = vmatpush.msra.mxu2 %v1022_v24 }
 0x122   :  { %v193_v34 = vpop.f32.mrf.mxu3 }
 0x123   :  { %v197_v35 = vrot.slane %v193_v34, 6  ;;  %v169_v36 = vpop.f32.mrf.mxu2 }
 0x124   :  { %v1075_v37 = vadd.f32 %v1072_v33, %v169_v36  ;;  %v614_v36 = vld [vmem:[%s1226_s7 + $0x8] sm:$0xff] }
 0x125   :  { %v199_v38 = vadd.f32 %v197_v35, %v1051_v28  ;;  %v616_v35 = vld [vmem:[%s1226_s7 + $0x18] sm:$0xff] }
 0x126   :  { %v172_v39 = vmax.f32 %v1075_v37, 0.0 }
 0x127   :  { %v200_v40 = vmax.f32 %v199_v38, 0.0 }
 0x128   :  { %v202_v41 = vrot.slane %v172_v39, 6 }
 0x129   :  { %v233_v42 = vrot.slane %v200_v40, 2 }
 0x12a   :  { %203 = vrot.lane.b32.xlu0 %v202_v41, %s830_s18 }
 0x12b   :  { %726 = vmatmul.msk.f32.vlgmr.msrb.gmra.mxu3 %vm117_vm0, %v233_v42 }
 0x12c   :  { %394 = vmatpush.msrb.mxu3 %v933_v9 }
 0x12e   :  { %395 = vmatpush.msrb.mxu3 %v945_v12 }
 0x130   :  { %396 = vmatpush.msrb.mxu3 %v951_v13 }
 0x132   :  { %397 = vmatpush.msrb.mxu3 %v962_v15 }
 0x134   :  { %398 = vmatpush.msrb.mxu3 %v1000_v21 }
 0x136   :  { %399 = vmatpush.msrb.mxu3 %v1007_v22 }
 0x138   :  { %400 = vmatpush.msrb.mxu3 %v1015_v23 }
 0x13a   :  { %401 = vmatpush.msrb.mxu3 %v1022_v24 }
 0x19c   :  { %v204_v43 = vpop.permute.xlu0 %203 }
 0x19d   :  { %v206_v44 = vsel %vm117_vm0, %v200_v40, %v204_v43 }
 0x19e   :  { %v208_v45 = vrot.slane %v206_v44, 2  ;;  %v1172_v44 = vld [vmem:[%s1227_s8] sm:$0x3] }
 0x1a0   :  { %725 = vmatmul.msk.f32.vlgmr.msrb.gmra.mxu1 %vm148_vm2, %v208_v45 }
 0x1a1   :  { %422 = vmatpush.msrb.mxu1 %v909_v3 }
 0x1a3   :  { %423 = vmatpush.msrb.mxu1 %v915_v4 }
 0x1a5   :  { %424 = vmatpush.msrb.mxu1 %v923_v6 }
 0x1a7   :  { %425 = vmatpush.msrb.mxu1 %v938_v10 }
 0x1ae   :  { %v253_v46 = vpop.f32.mrf.mxu3 }
 0x1af   :  { %v257_v47 = vrot.slane %v253_v46, 4 }
 0x1b1   :  { %v259_v48 = vadd.f32 %v257_v47, %v1051_v28  ;;  %v624_v47 = vperm.slane %v1172_v44, 1 }
 0x1b3   :  { %v260_v49 = vmax.f32 %v259_v48, 0.0 }
 0x1b5   :  { %v293_v50 = vrot.slane %v260_v49, 4 }
 0x1b7   :  { %728 = vmatmul.msk.f32.vlgmr.msra.gmra.mxu3 %vm117_vm0, %v293_v50  ;;  %v619_v50 = vld [vmem:[%s1226_s7 + $0x30] sm:$0xff] }
 0x1b8   :  { %542 = vmatpush.msra.mxu3 %v909_v3 }
 0x1ba   :  { %543 = vmatpush.msra.mxu3 %v915_v4 }
 0x1bc   :  { %544 = vmatpush.msra.mxu3 %v923_v6 }
 0x1be   :  { %545 = vmatpush.msra.mxu3 %v938_v10 }
 0x21d   :  { %v228_v51 = vpop.f32.mrf.mxu1 }
 0x21e   :  { %v229_v52 = vadd.f32 %v1072_v33, %v228_v51  ;;  %v617_v51 = vld [vmem:[%s1226_s7 + $0x20] sm:$0xff] }
 0x220   :  { %v231_v53 = vmax.f32 %v229_v52, 0.0  ;;  %v615_v52 = vld [vmem:[%s1226_s7 + $0x10] sm:$0xff] }
 0x222   :  { %v262_v55 = vrot.slane %v231_v53, 4  ;;  %v591_v7 = vrot.slane %v231_v53, 6  ;;  %v613_v53 = vld [vmem:[%s1226_s7] sm:$0xff] }
 0x224   :  { %263 = vrot.lane.b32.xlu1 %v262_v55, %s830_s18  ;;  %v605_v14 = vsel %vm604_vm3, %v172_v39, %v591_v7 }
 0x23a   :  { %v313_v56 = vpop.f32.mrf.mxu3 }
 0x23b   :  { %v317_v57 = vrot.slane %v313_v56, 2 }
 0x23d   :  { %v319_v58 = vadd.f32 %v317_v57, %v1051_v28 }
 0x23f   :  { %v320_v59 = vmax.f32 %v319_v58, 0.0 }
 0x241   :  { %v353_v60 = vrot.slane %v320_v59, 6 }
 0x243   :  { %730 = vmatmul.msk.f32.vlgmr.msra.gmra.mxu1 %vm117_vm0, %v353_v60 }
 0x244   :  { %513 = vmatpush.msra.mxu1 %v933_v9 }
 0x246   :  { %514 = vmatpush.msra.mxu1 %v945_v12 }
 0x248   :  { %515 = vmatpush.msra.mxu1 %v951_v13 }
 0x24a   :  { %516 = vmatpush.msra.mxu1 %v962_v15 }
 0x24c   :  { %517 = vmatpush.msra.mxu1 %v1000_v21 }
 0x24e   :  { %518 = vmatpush.msra.mxu1 %v1007_v22 }
 0x250   :  { %519 = vmatpush.msra.mxu1 %v1015_v23 }
 0x252   :  { %520 = vmatpush.msra.mxu1 %v1022_v24 }
 0x296   :  { %v264_v61 = vpop.permute.xlu1 %263 }
 0x297   :  { %v266_v62 = vsel %vm117_vm0, %v260_v49, %v264_v61  ;;  %v623_v61 = vperm.slane %v1172_v44, 0 }
 0x298   :  { %v268_v63 = vrot.slane %v266_v62, 4 }
 0x29a   :  { %727 = vmatmul.msk.f32.vlgmr.msrb.gmra.mxu2 %vm148_vm2, %v268_v63 }
 0x29b   :  { %645 = vmatpush.msrb.mxu2 %v619_v50 }
 0x29d   :  { %646 = vmatpush.msrb.mxu2 %v617_v51 }
 0x29f   :  { %647 = vmatpush.msrb.mxu2 %v615_v52 }
 0x2a1   :  { %648 = vmatpush.msrb.mxu2 %v613_v53 }
 0x2c0   :  { %v373_v2 = vpop.f32.mrf.mxu1 }
 0x2c1   :  { %v376_v3 = vadd.f32 %v373_v2, %v1122_v1 }
 0x2c3   :  { %v377_v4 = vmax.f32 %v376_v3, 0.0 }
 0x2c5   :  { %732 = vmatmul.msk.f32.vlgmr.msrb.gmra.mxu1 %vm117_vm0, %v377_v4 }
 0x31d   :  { %v288_v5 = vpop.f32.mrf.mxu2 }
 0x31e   :  { %v289_v6 = vadd.f32 %v1072_v33, %v288_v5 }
 0x320   :  { %v291_v8 = vmax.f32 %v289_v6, 0.0 }
 0x322   :  { %v593_v10 = vrot.slane %v291_v8, 4  ;;  %v322_v11 = vrot.slane %v291_v8, 2 }
 0x324   :  { %v607_v16 = vsel %vm606_vm4, %v605_v14, %v593_v10  ;;  %323 = vrot.lane.b32.xlu1 %v322_v11, %s830_s18 }
 0x342   :  { %v427_v17 = vpop.f32.mrf.mxu1 }
 0x343   :  { %v431_v18 = vrot.slane %v427_v17, 6 }
 0x345   :  { %v1134_v25 = vadd.f32 %v431_v18, %v1122_v1 }
 0x347   :  { %v434_v27 = vmax.f32 %v1134_v25, 0.0 }
 0x349   :  { %v467_v28 = vrot.slane %v434_v27, 2 }
 0x396   :  { %v324_v19 = vpop.permute.xlu1 %323 }
 0x397   :  { %v326_v20 = vsel %vm117_vm0, %v320_v59, %v324_v19 }
 0x398   :  { %v328_v26 = vrot.slane %v326_v20, 6 }
 0x39a   :  { %729 = vmatmul.msk.f32.vlgmr.msrb.gmra.mxu0 %vm148_vm2, %v328_v26 }
 0x39b   :  { %573 = vmatpush.msrb.mxu0 %v933_v9 }
 0x39d   :  { %574 = vmatpush.msrb.mxu0 %v945_v12 }
 0x39f   :  { %575 = vmatpush.msrb.mxu0 %v951_v13 }
 0x3a1   :  { %576 = vmatpush.msrb.mxu0 %v962_v15 }
 0x3a2   :  { %734 = vmatmul.msk.f32.vlgmr.msra.gmra.mxu0 %vm117_vm0, %v467_v28 }
 0x3a3   :  { %577 = vmatpush.msrb.mxu0 %v1000_v21 }
 0x3a5   :  { %578 = vmatpush.msrb.mxu0 %v1007_v22  ;;  %v620_v22 = vld [vmem:[%s1226_s7 + $0x38] sm:$0xff] }
 0x3a7   :  { %579 = vmatpush.msrb.mxu0 %v1015_v23 }
 0x3a9   :  { %580 = vmatpush.msrb.mxu0 %v1022_v24  ;;  %v618_v24 = vld [vmem:[%s1226_s7 + $0x28] sm:$0xff]  ;;  %s832_s7 = smov [#allocation6]  }
 0x3aa   :  { %s700_s1 = sshll.u32 %s832_s7, 4  ;;  %s701_s1 = int_to_ptr.vmem [resolvable:$true] %s700_s1 }
 0x417   :  { %v348_v9 = vpop.f32.mrf.mxu0 }
 0x418   :  { %v349_v29 = vadd.f32 %v1072_v33, %v348_v9 }
 0x41a   :  { %v351_v30 = vmax.f32 %v349_v29, 0.0 }
 0x41c   :  { %v595_v12 = vrot.slane %v351_v30, 2  ;;  %379 = vrot.lane.b32.xlu2 %v351_v30, %s830_s18 }
 0x41e   :  { %v609_v13 = vsel %vm608_vm5, %v607_v16, %v595_v12 }
 0x41f   :  { %v487_v15 = vpop.f32.mrf.mxu0 }
 0x420   :  { %v491_v31 = vrot.slane %v487_v15, 4 }
 0x422   :  { %v493_v21 = vadd.f32 %v491_v31, %v1122_v1 }
 0x424   :  { %v494_v34 = vmax.f32 %v493_v21, 0.0 }
 0x426   :  { %v527_v37 = vrot.slane %v494_v34, 4 }
 0x476   :  { %v380_v32 = vpop.permute.xlu2 %379 }
 0x477   :  { %v382_v23 = vsel %vm117_vm0, %v377_v4, %v380_v32 }
 0x478   :  { %731 = vmatmul.msk.f32.vlgmr.msrb.gmra.mxu3 %vm148_vm2, %v382_v23 }
 0x479   :  { %668 = vmatpush.msrb.mxu3 %v620_v22 }
 0x47b   :  { %669 = vmatpush.msrb.mxu3 %v618_v24 }
 0x47d   :  { %670 = vmatpush.msrb.mxu3 %v616_v35 }
 0x47f   :  { %671 = vmatpush.msrb.mxu3 %v614_v36 }
 0x480   :  { %736 = vmatmul.msk.f32.vlgmr.msra.gmra.mxu3 %vm117_vm0, %v527_v37 }
 0x488   :  { %740 = vmatmul.msk.f32.vlgmr.msrb.gmra.mxu3 %vm117_vm0, %v609_v13 }
 0x4fb   :  { %v403_v38 = vpop.f32.mrf.mxu3 }
 0x4fc   :  { %v404_v39 = vadd.f32 %v1072_v33, %v403_v38 }
 0x4fe   :  { %v406_v40 = vmax.f32 %v404_v39, 0.0 }
 0x500   :  { %v436_v41 = vrot.slane %v406_v40, 6 }
 0x502   :  { %437 = vrot.lane.b32.xlu2 %v436_v41, %s830_s18 }
 0x503   :  { %v547_v42 = vpop.f32.mrf.mxu3 }
 0x504   :  { %v551_v43 = vrot.slane %v547_v42, 2 }
 0x506   :  { %v553_v45 = vadd.f32 %v551_v43, %v1122_v1 }
 0x508   :  { %v554_v46 = vmax.f32 %v553_v45, 0.0 }
 0x50a   :  { %587 = vst.msk [vmem:[#allocation6 - $0x6] sm:$0xc0] %vm586_vm6, %v554_v46 }
 0x50b   :  { %v673_v48 = vpop.f32.mrf.mxu3 }
 0x50c   :  { %v674_v49 = vadd.f32 %v673_v48, %v624_v47 }
 0x50e   :  { %680 = vst [vmem:[#allocation5 + $0x8] sm:$0xff] %v674_v49 }
 0x55c   :  { %v438_v54 = vpop.permute.xlu2 %437 }
 0x55d   :  { %v440_v55 = vsel %vm117_vm0, %v434_v27, %v438_v54 }
 0x55e   :  { %v442_v56 = vrot.slane %v440_v55, 2 }
 0x560   :  { %733 = vmatmul.msk.f32.vlgmr.msra.gmra.mxu2 %vm148_vm2, %v442_v56 }
 0x568   :  { %738 = vmatmul.msk.f32.vlgmr.msrb.gmra.mxu2 %vm117_vm0, %v609_v13 }
 0x5e3   :  { %v462_v57 = vpop.f32.mrf.mxu2 }
 0x5e4   :  { %v463_v58 = vadd.f32 %v1072_v33, %v462_v57 }
 0x5e6   :  { %v465_v59 = vmax.f32 %v463_v58, 0.0 }
 0x5e8   :  { %v496_v60 = vrot.slane %v465_v59, 4  ;;  %v597_v5 = vrot.slane %v465_v59, 6 }
 0x5ea   :  { %497 = vrot.lane.b32.xlu0 %v496_v60, %s830_s18  ;;  %v610_v10 = vsel %vm604_vm3, %v406_v40, %v597_v5 }
 0x5eb   :  { %v650_v62 = vpop.f32.mrf.mxu2 }
 0x5ec   :  { %v651_v63 = vadd.f32 %v650_v62, %v623_v61 }
 0x5ee   :  { %679 = vst [vmem:[#allocation5] sm:$0xff] %v651_v63 }
 0x65c   :  { %v498_v0 = vpop.permute.xlu0 %497 }
 0x65d   :  { %v500_v1 = vsel %vm117_vm0, %v494_v34, %v498_v0 }
 0x65e   :  { %v502_v2 = vrot.slane %v500_v1, 4 }
 0x660   :  { %735 = vmatmul.msk.f32.vlgmr.msra.gmra.mxu1 %vm148_vm2, %v502_v2 }
 0x6dd   :  { %v522_v3 = vpop.f32.mrf.mxu1 }
 0x6de   :  { %v523_v4 = vadd.f32 %v1072_v33, %v522_v3 }
 0x6e0   :  { %v525_v6 = vmax.f32 %v523_v4, 0.0 }
 0x6e2   :  { %v599_v7 = vrot.slane %v525_v6, 4  ;;  %v556_v8 = vrot.slane %v525_v6, 2 }
 0x6e4   :  { %557 = vrot.lane.b32.xlu1 %v556_v8, %s830_s18  ;;  %v611_v11 = vsel %vm606_vm4, %v610_v10, %v599_v7 }
 0x756   :  { %v558_v14 = vpop.permute.xlu1 %557 }
 0x757   :  { %v560_v16 = vsel %vm117_vm0, %v554_v46, %v558_v14 }
 0x758   :  { %v562_v17 = vrot.slane %v560_v16, 6 }
 0x75a   :  { %737 = vmatmul.msk.f32.vlgmr.msrb.gmra.mxu0 %vm148_vm2, %v562_v17 }
 0x7d7   :  { %v582_v18 = vpop.f32.mrf.mxu0 }
 0x7d8   :  { %v583_v19 = vadd.f32 %v1072_v33, %v582_v18 }
 0x7da   :  { %v585_v20 = vmax.f32 %v583_v19, 0.0 }
 0x7dc   :  { %590 = vst.msk [vmem:[#allocation6 + $0x2] sm:$0x3] %vm589_vm7, %v585_v20  ;;  %v602_v25 = vrot.slane %v585_v20, 2 }
 0x7dd   :  { %708 = dma.vmem_to_hbm [thread:$0]  %s701_s1, 64, %s703_s24, [#allocation7], %s830_s18, %s830_s18, %s831_s19  }
 0x7de   :  { %v612_v26 = vsel %vm608_vm5, %v611_v11, %v602_v25 }
 0x7df   :  { %739 = vmatmul.msk.f32.gmra.mxu2 %vm117_vm0, %v612_v26  ;;  %741 = vmatmul.msk.f32.gmra.mxu3 %vm117_vm0, %v612_v26 }
 0x862   :  { %v653_v33 = vpop.f32.mrf.mxu2  ;;  %v676_v27 = vpop.f32.mrf.mxu3 }
 0x863   :  { %v654_v28 = vadd.f32 %v653_v33, %v623_v61  ;;  %v677_v9 = vadd.f32 %v676_v27, %v624_v47 }
 0x865   :  { %681 = vst [vmem:[#allocation5 + $0x10] sm:$0xff] %v654_v28 }
 0x866   :  { %682 = vst [vmem:[#allocation5 + $0x18] sm:$0xff] %v677_v9 }
 0x867   :  { %695 = dma.vmem_to_hbm [thread:$0]  %s688_s25, 512, %s690_s0, [#allocation4], %s834_s10, %s834_s10, %s835_s27  }
 0x868   :  { %825 = dma.done.wait [#allocation4], 512  }
 0x869   :  { %826 = vsyncadd [#allocation4], 4294966784 }
 0x86a   :  { %827 = dma.done.wait [#allocation7], 64  }
 0x86b   :  { %828 = vsyncadd [#allocation7], 4294967232 }
 0x86c   :  { %717 = vsyncpa [#allocation3], 1 }
 0x86d   :  { %718 = vsyncpa [#allocation4], 1 }
 0x86e   :  { %719 = vsyncpa [#allocation7], 1 }

</bundles_post_ra>
